<compile_context>
chip_gen: v7x
topology: tpu7x:2x2x1
jax: 0.10.0
libtpu: 0.0.40
codegen_flags: <defaults>
</compile_context>

<pallas_src>
import jax
import jax.numpy as jnp
from jax import lax
from jax.experimental import pallas as pl
from jax.experimental.pallas import tpu as pltpu


def _round_up(x, m):
    return ((x + m - 1) // m) * m


def _vmem_capacity_bytes():
    """Physical VMEM per TensorCore, with a conservative (v7x-safe) fallback."""
    try:
        info = pltpu.get_tpu_info()
        for name in ("vmem_capacity_bytes", "vmem_bytes", "vmem_size_bytes"):
            cap = getattr(info, name, None)
            if cap:
                return int(cap)
    except Exception:
        pass
    return 64 * 1024 * 1024


def _pick_row_tile(n_rows, tile_cap, prefer):
    """Largest MXU/sublane-friendly row tile within the VMEM-derived cap."""
    t = max(16, min(int(tile_cap), int(prefer)))
    for align in (256, 128, 16):   # MXU rows (v6e/v7x) > (v5e) > bf16 sublane pack
        if t >= align:
            t = (t // align) * align
            break
    t = max(8, t)
    if n_rows <= t:
        if n_rows >= 256:          # enough work: split into 2 tiles for v7x's 2 TCs
            return _round_up(pl.cdiv(n_rows, 2), 16)
        return _round_up(max(n_rows, 8), 8)
    g = pl.cdiv(n_rows, t)
    if g % 2:                      # keep the parallel grid even so both TCs stay busy
        t = max(16, _round_up(pl.cdiv(n_rows, g + 1), 16))
    return t


def _patch_embed_kernel(x_ref, w_ref, b_ref, o_ref):
    """Fused spectral-adapter + patch-projection: one MXU matmul + bias add.

    x_ref: (TN, K)  flattened patches (K = p*p*C_in), compute dtype (bf16)
    w_ref: (K, TD)  folded weight tile (bf16)
    b_ref: (1, TD)  folded bias tile (f32)
    o_ref: (TN, TD) output tile (compute dtype)
    """
    acc = jnp.dot(x_ref[...], w_ref[...], preferred_element_type=jnp.float32)
    o_ref[...] = (acc + b_ref[...]).astype(o_ref.dtype)


def patch_embed_wrapper_forward(x, w1, b1, w2, b2, *, patch, tile_n=1024,
                                tile_d=None, compute_dtype=jnp.bfloat16):
    """x: (B, C_in, H, W) NCHW -> (B, num_patches, D) in `compute_dtype` (bf16)."""
    B, C, H, W = x.shape
    C_mid = w1.shape[0]
    D = w2.shape[0]
    p = patch
    Hp, Wp = H // p, W // p
    N = B * Hp * Wp
    PP = p * p
    K = PP * C

    # ---- fold the 1x1 adapter into the patch-conv weights (runs once, in XLA, f32) ----
    w1m = w1.reshape(C_mid, C).astype(jnp.float32)          # (C_mid, C_in)
    w2m = w2.reshape(D, C_mid, PP).astype(jnp.float32)      # (D, C_mid, PP), q = ph*p + pw
    # Wf[q*C_in + c, d] = sum_m w1[m, c] * w2[d, m, q]
    wf = jnp.einsum("mc,dmq->qcd", w1m, w2m).reshape(K, D)
    bias = b2.astype(jnp.float32) + jnp.einsum(
        "m,dmq->d", b1.astype(jnp.float32), w2m)

    # ---- patch-major, channel-minor activation layout: (N, K), cast BEFORE transpose ----
    # TODO(synk): fold this patchify into the kernel DMA (NHWC input or a 2-D grid
    # gathering (1, C, p, W) strips via BlockSpec) to remove the extra HBM round trip.
    xp = (
        x.astype(compute_dtype)
        .reshape(B, C, Hp, p, Wp, p)
        .transpose(0, 2, 4, 3, 5, 1)          # (B, Hp, Wp, ph, pw, C)
        .reshape(N, K)
    )

    D_pad = _round_up(D, 128)                 # lane-dense output -> unmasked stores

    x_item = jnp.dtype(compute_dtype).itemsize
    w_item = jnp.dtype(compute_dtype).itemsize
    o_item = jnp.dtype(compute_dtype).itemsize

    vmem_phys = _vmem_capacity_bytes()
    vmem_budget = int(vmem_phys * 0.75)       # headroom for compiler scratch / semaphores

    w_bytes_full = K * D_pad * w_item         # single copy (Buffered(1))
    bias_bytes_full = 8 * D_pad * 4           # sublane-padded, single copy
    per_row_full = 2 * (K * x_item + D_pad * o_item)   # double-buffered x + out tiles

    use_d_tiles = (tile_d is not None) or (
        w_bytes_full + bias_bytes_full + 16 * per_row_full > vmem_budget)

    if not use_d_tiles:
        # Single weight block, resident in VMEM for the whole kernel.
        tile_cap = max(16, (vmem_budget - w_bytes_full - bias_bytes_full) // per_row_full)
        tn = _pick_row_tile(N, tile_cap, tile_n)
        usage = w_bytes_full + bias_bytes_full + tn * per_row_full
        x_spec = pl.BlockSpec((tn, K), lambda i: (i, 0))
        w_spec = pl.BlockSpec((K, D_pad), lambda i: (0, 0),
                              pipeline_mode=pl.Buffered(1))
        b_spec = pl.BlockSpec((1, D_pad), lambda i: (0, 0),
                              pipeline_mode=pl.Buffered(1))
        o_spec = pl.BlockSpec((tn, D_pad), lambda i: (i, 0))
        grid = (pl.cdiv(N, tn),)
        semantics = ("parallel",)
    else:
        # Folded weight too large for one VMEM block (e.g. big hyperspectral K on v7x):
        # 2-D grid over (D tiles, row tiles); D is outermost so each weight tile stays
        # resident across the entire inner row sweep (x is re-read grid_d times).
        # TODO(synk): add a K-tiled accumulator variant for the rare case where even a
        # single (K, 128) weight column does not fit in VMEM.
        if tile_d is None:
            td = ((vmem_budget // 2) // (2 * K * w_item)) // 128 * 128
            td = int(min(D_pad, max(128, td)))
        else:
            td = int(min(D_pad, max(128, _round_up(int(tile_d), 128))))
        D_pad = _round_up(D_pad, td)          # blocks tile D exactly
        w_tile_bytes = 2 * K * td * w_item    # double-buffered across D tiles
        bias_tile_bytes = 2 * 8 * td * 4
        per_row = 2 * (K * x_item + td * o_item)
        tile_cap = max(16, (vmem_budget - w_tile_bytes - bias_tile_bytes) // per_row)
        tn = _pick_row_tile(N, tile_cap, tile_n)
        usage = w_tile_bytes + bias_tile_bytes + tn * per_row
        grid_d = D_pad // td
        x_spec = pl.BlockSpec((tn, K), lambda j, i: (i, 0))
        w_spec = pl.BlockSpec((K, td), lambda j, i: (0, j))
        b_spec = pl.BlockSpec((1, td), lambda j, i: (0, j))
        o_spec = pl.BlockSpec((tn, td), lambda j, i: (i, j))
        grid = (grid_d, pl.cdiv(N, tn))
        semantics = ("parallel", "parallel")

    grid_n = grid[-1]
    N_pad = grid_n * tn
    if N_pad != N:
        xp = jnp.pad(xp, ((0, N_pad - N), (0, 0)))
    wf = wf.astype(compute_dtype)
    if D_pad != D:
        wf = jnp.pad(wf, ((0, 0), (0, D_pad - D)))
        bias = jnp.pad(bias, ((0, D_pad - D),))
    bias = bias.reshape(1, D_pad).astype(jnp.float32)

    # Exact usage + small headroom, capped at the generation-aware budget.
    vmem_limit = int(min(vmem_budget, usage + (4 << 20)))
    vmem_limit = max(vmem_limit, 16 << 20)

    out = pl.pallas_call(
        _patch_embed_kernel,
        out_shape=jax.ShapeDtypeStruct((N_pad, D_pad), compute_dtype),
        grid_spec=pltpu.PrefetchScalarGridSpec(
            num_scalar_prefetch=0,
            grid=grid,
            in_specs=[x_spec, w_spec, b_spec],
            out_specs=o_spec,
        ),
        compiler_params=pltpu.CompilerParams(
            dimension_semantics=semantics,
            vmem_limit_bytes=vmem_limit,
        ),
    )(xp, wf, bias)

    return out[:N, :D].reshape(B, Hp * Wp, D)


def ref_forward(x, w1, b1, w2, b2, patch):
    """Pure-JAX reference (mirrors the PyTorch forward) for correctness check."""
    y = lax.conv_general_dilated(
        x, w1, window_strides=(1, 1), padding="VALID",
        dimension_numbers=("NCHW", "OIHW", "NCHW"),
    ) + b1[None, :, None, None]
    z = lax.conv_general_dilated(
        y, w2, window_strides=(patch, patch), padding="VALID",
        dimension_numbers=("NCHW", "OIHW", "NCHW"),
    ) + b2[None, :, None, None]
    B, D, Hp, Wp = z.shape
    # timm PatchEmbed: flatten(2).transpose(1, 2)
    return z.reshape(B, D, Hp * Wp).transpose(0, 2, 1)


if __name__ == "__main__":
    # Small shapes consistent with the module: hyperspectral NCHW input.
    B, C_in, H, W = 2, 4, 16, 16
    C_mid, D, p = 8, 32, 4

    key = jax.random.PRNGKey(0)
    k_x, k_w1, k_b1, k_w2, k_b2 = jax.random.split(key, 5)

    x = jax.random.normal(k_x, (B, C_in, H, W), jnp.float32)
    # spectral_adapter: Conv2d(C_in, C_mid, kernel_size=1)
    w1 = jax.random.normal(k_w1, (C_mid, C_in, 1, 1), jnp.float32) * 0.1
    b1 = jax.random.normal(k_b1, (C_mid,), jnp.float32) * 0.1
    # original_patch_embed.proj: Conv2d(C_mid, D, kernel_size=p, stride=p)
    w2 = jax.random.normal(k_w2, (D, C_mid, p, p), jnp.float32) * 0.1
    b2 = jax.random.normal(k_b2, (D,), jnp.float32) * 0.1

    # Main path: single resident weight block, 1-D parallel grid over row tiles.
    out = patch_embed_wrapper_forward(x, w1, b1, w2, b2, patch=p)
    out = jax.block_until_ready(out)
    ref = ref_forward(x, w1, b1, w2, b2, p)
    assert out.shape == (B, (H // p) * (W // p), D), out.shape
    # bf16 activations/weights/output with f32 accumulation -> relaxed tolerance.
    err = float(jnp.max(jnp.abs(out.astype(jnp.float32) - ref)))
    assert err < 3e-2, err

    # Exercise the D-tiled fallback (2-D grid, weight tile resident per D stripe).
    D2 = 256
    k_w2b, k_b2b = jax.random.split(k_w2, 2)
    w2b = jax.random.normal(k_w2b, (D2, C_mid, p, p), jnp.float32) * 0.1
    b2b = jax.random.normal(k_b2b, (D2,), jnp.float32) * 0.1
    out2 = patch_embed_wrapper_forward(x, w1, b1, w2b, b2b, patch=p,
                                       tile_n=16, tile_d=128)
    out2 = jax.block_until_ready(out2)
    ref2 = ref_forward(x, w1, b1, w2b, b2b, p)
    assert out2.shape == ref2.shape, (out2.shape, ref2.shape)
    err2 = float(jnp.max(jnp.abs(out2.astype(jnp.float32) - ref2)))
    assert err2 < 3e-2, err2

    print("KERNEL_OK")
</pallas_src>

<mosaic_0001>
module attributes {stable_mosaic.version = 11 : i64} {
  func.func @_patch_embed_kernel(%arg0: i32, %arg1: memref<32x64xbf16, #tpu.memory_space<vmem>>, %arg2: memref<64x128xbf16, #tpu.memory_space<vmem>>, %arg3: memref<1x128xf32, #tpu.memory_space<vmem>>, %arg4: memref<32x128xbf16, #tpu.memory_space<vmem>>) attributes {dimension_semantics = [#tpu.dimension_semantics<parallel>], iteration_bounds = array<i64: 1>, scalar_prefetch = 0 : i64, scratch_operands = 0 : i64, tpu.core_type = #tpu.core_type<tc>, window_params = [{transform_indices = @transform_0, window_bounds = array<i64: 32, 64>}, {pipeline_mode = #tpu.pipeline_mode<synchronous>, transform_indices = @transform_1, window_bounds = array<i64: 64, 128>}, {pipeline_mode = #tpu.pipeline_mode<synchronous>, transform_indices = @transform_2, window_bounds = array<i64: 1, 128>}, {transform_indices = @transform_3, window_bounds = array<i64: 32, 128>}]} {
    %c0 = arith.constant 0 : index
    %c0_0 = arith.constant 0 : index
    %0 = vector.load %arg1[%c0, %c0_0] : memref<32x64xbf16, #tpu.memory_space<vmem>>, vector<32x64xbf16>
    %c0_1 = arith.constant 0 : index
    %c0_2 = arith.constant 0 : index
    %1 = vector.load %arg2[%c0_1, %c0_2] : memref<64x128xbf16, #tpu.memory_space<vmem>>, vector<64x128xbf16>
    %cst = arith.constant dense<0.000000e+00> : vector<32x128xf32>
    %2 = tpu.matmul %0, %1, %cst {dimension_numbers = #tpu.dot_dimension_numbers<[1], [0], [0], [1], [0, 0, 1, 1], [], []>} : vector<32x64xbf16>, vector<64x128xbf16>, vector<32x128xf32> -> vector<32x128xf32>
    %c0_3 = arith.constant 0 : index
    %c0_4 = arith.constant 0 : index
    %3 = vector.load %arg3[%c0_3, %c0_4] : memref<1x128xf32, #tpu.memory_space<vmem>>, vector<1x128xf32>
    %4 = vector.broadcast %3 : vector<1x128xf32> to vector<32x128xf32>
    %5 = arith.addf %2, %4 : vector<32x128xf32>
    %6 = arith.truncf %5 : vector<32x128xf32> to vector<32x128xbf16>
    %c0_5 = arith.constant 0 : index
    %c0_6 = arith.constant 0 : index
    %7 = vector.load %arg4[%c0_5, %c0_6] : memref<32x128xbf16, #tpu.memory_space<vmem>>, vector<32x128xbf16>
    tpu.vector_store %arg4[%c0_5, %c0_6], %6 {strides = array<i32>} : memref<32x128xbf16, #tpu.memory_space<vmem>>, vector<32x128xbf16>,
    return
  }
  func.func @transform_0(%arg0: i32) -> (i32, i32) {
    %c0_i32 = arith.constant 0 : i32
    %c0_i32_0 = arith.constant 0 : i32
    return %arg0, %c0_i32 : i32, i32
  }
  func.func @transform_1(%arg0: i32) -> (i32, i32) {
    %c0_i32 = arith.constant 0 : i32
    %c0_i32_0 = arith.constant 0 : i32
    %c0_i32_1 = arith.constant 0 : i32
    return %c0_i32, %c0_i32_0 : i32, i32
  }
  func.func @transform_2(%arg0: i32) -> (i32, i32) {
    %c0_i32 = arith.constant 0 : i32
    %c0_i32_0 = arith.constant 0 : i32
    %c0_i32_1 = arith.constant 0 : i32
    return %c0_i32, %c0_i32_0 : i32, i32
  }
  func.func @transform_3(%arg0: i32) -> (i32, i32) {
    %c0_i32 = arith.constant 0 : i32
    %c0_i32_0 = arith.constant 0 : i32
    return %arg0, %c0_i32 : i32, i32
  }
}

</mosaic_0001>

<bundles_post_ra>
// kernel: tpu_custom_call.1
= control target key start
LH: loop header
LB: loop body
LE: loop exit
PB: predicated region body
PF: predicated region fallthrough
CT: control target
= control target key end

     0   :  { %8 = vsyncpa [#allocation3], 0  ;;  %s393_s0 = inlined_call_operand.hbm [shape: bf16[32,64], index: 0, kind: input, shape index: {}]   ;;  %s394_s1 = inlined_call_operand.hbm [shape: bf16[64,128], index: 1, kind: input, shape index: {}]   ;;  %s395_s2 = inlined_call_operand.vmem [shape: f32[1,128], index: 2, kind: input, shape index: {}]   ;;  %s396_s3 = inlined_call_operand.hbm [shape: bf16[32,128], index: 3, kind: output, shape index: {}]  }
   0x1   :  { %9 = vsyncpa [#allocation6], 0 }
   0x2   :  { %10 = vsyncpa [#allocation4], 0  ;;  %s320_s12 = smov [#allocation2]   ;;  %s248_s16 = scalar_lea.hbm %s393_s0, 256 }
   0x3   :  { %s16_s13 = sshll.u32 %s320_s12, 4  ;;  %p249_p0 = scmp.ne.s32.totalorder %s393_s0, %s248_s16  ;;  %s17_s13 = int_to_ptr.vmem [resolvable:$true] %s16_s13 }
   0x4   :  { %p252_p1 = scmp.lt.u32.totalorder %s248_s16, %s393_s0 }
   0x6   :  { %p254_p2 = pnand %p252_p1, %p249_p0 }
   0x8   :  { %257 = shalt.err (!%p254_p2)
}
   0x9   :  { %s258_s21 = scalar_lea.vmem %s17_s13, 256  ;;  %p263_p4 = scmp.lt.s32.totalorder %s17_s13, %s17_s13 }
   0xa   :  { %p259_p3 = scmp.ne.s32.totalorder %s17_s13, %s258_s21  ;;  %p264_p5 = scmp.lt.s32.totalorder %s258_s21, %s258_s21 }
   0xc   :  { %p265_p6 = por %p264_p5, %p263_p4 }
   0xe   :  { %p266_p7 = pnand %p265_p6, %p259_p3 }
  0x10   :  { %269 = shalt.err (!%p266_p7)
}
  0x11   :  { %s321_s22 = smov 64   ;;  %s322_s23 = smov 4  }
  0x12   :  { %22 = dma.hbm_to_vmem [thread:$0]  %s393_s0, 256, %s17_s13, [#allocation3], %s321_s22, %s321_s22, %s322_s23  }
  0x13   :  { %s323_s26 = smov [#allocation5]   ;;  %s270_s30 = scalar_lea.hbm %s394_s1, 512 }
  0x14   :  { %s28_s27 = sshll.u32 %s323_s26, 4  ;;  %p271_p8 = scmp.ne.s32.totalorder %s394_s1, %s270_s30  ;;  %s29_s27 = int_to_ptr.vmem [resolvable:$true] %s28_s27 }
  0x15   :  { %p274_p9 = scmp.lt.u32.totalorder %s270_s30, %s394_s1 }
  0x17   :  { %p276_p10 = pnand %p274_p9, %p271_p8 }
  0x19   :  { %279 = shalt.err (!%p276_p10)
}
  0x1a   :  { %s280_s8 = scalar_lea.vmem %s29_s27, 512  ;;  %p285_p12 = scmp.lt.s32.totalorder %s29_s27, %s29_s27 }
  0x1b   :  { %p281_p11 = scmp.ne.s32.totalorder %s29_s27, %s280_s8  ;;  %p286_p13 = scmp.lt.s32.totalorder %s280_s8, %s280_s8 }
  0x1d   :  { %p287_p0 = por %p286_p13, %p285_p12 }
  0x1f   :  { %p288_p1 = pnand %p287_p0, %p281_p11 }
  0x21   :  { %291 = shalt.err (!%p288_p1)
}
  0x22   :  { %34 = dma.hbm_to_vmem [thread:$0]  %s394_s1, 512, %s29_s27, [#allocation6], %s321_s22, %s321_s22, %s322_s23  }
  0x23   :  { %314 = dma.done.wait [#allocation3], 256  }
  0x24   :  { %315 = vsyncadd [#allocation3], 4294967040 }
  0x25   :  { %316 = dma.done.wait [#allocation6], 512  }
  0x26   :  { %317 = vsyncadd [#allocation6], 4294966784  ;;  %v242_v0 = vld [vmem:[#allocation5] sm:$0xff]   ;;  %v243_v1 = vld [vmem:[#allocation5 + $0x8] sm:$0xff]   ;;  %vm97_vm0 = vcmask 523264   ;;  %s324_s11 = smov [#allocation7]  }
  0x27   :  { %225 = vmatprep.subr.bf16.mxu0 %v242_v0  ;;  %v244_v2 = vld [vmem:[#allocation5 + $0x10] sm:$0xff]   ;;  %v245_v4 = vld [vmem:[#allocation5 + $0x18] sm:$0xff]   ;;  %s178_s12 = sshll.u32 %s324_s11, 4  ;;  %s179_s12 = int_to_ptr.vmem [resolvable:$true] %s178_s12 }
  0x28   :  { %226 = vmatpush3.bf16.msra.mxu0 %v242_v0  ;;  %v246_v3 = vld [vmem:[#allocation2] sm:$0xff]   ;;  %v247_v5 = vld [vmem:[#allocation2 + $0x8] sm:$0xff]   ;;  %s292_s13 = scalar_lea.vmem %s179_s12, 256  ;;  %p297_p3 = scmp.lt.s32.totalorder %s179_s12, %s179_s12 }
  0x29   :  { %227 = vmatprep.subr.bf16.mxu0 %v243_v1  ;;  %233 = vmatprep.mubr.msk.bf16.mxu0 %vm97_vm0, %v246_v3  ;;  %v191_v7 = vld [vmem:[%s395_s2] ss:$0 sm:$0xff]  ;;  %p293_p2 = scmp.ne.s32.totalorder %s179_s12, %s292_s13  ;;  %p298_p4 = scmp.lt.s32.totalorder %s292_s13, %s292_s13 }
  0x2b   :  { %p299_p5 = por %p298_p4, %p297_p3 }
  0x2c   :  { %228 = vmatpush3.bf16.msra.mxu0 %v243_v1 }
  0x2d   :  { %229 = vmatprep.subr.bf16.mxu0 %v244_v2  ;;  %p300_p6 = pnand %p299_p5, %p293_p2 }
  0x30   :  { %230 = vmatpush3.bf16.msra.mxu0 %v244_v2 }
  0x31   :  { %231 = vmatprep.subr.bf16.mxu0 %v245_v4 }
  0x34   :  { %232 = vmatpush3.bf16.msra.mxu0 %v245_v4 }
  0x37   :  { %234 = vmatmul.mubr.msk.bf16.vlgmr.msra.gmra.mrb[0].mxu0 %vm97_vm0, %v247_v5 }
 0x10a   :  { %v235_v6 = vpop.f32.mrb[0].mxu0 }
 0x10b   :  { %v138_v8 = vpop.f32.mrb[1].mxu0  ;;  %v147_v10 = vadd.f32 %v235_v6, %v191_v7 }
 0x10c   :  { %v236_v9 = vpop.f32.mrb[2].mxu0  ;;  %v139_v13 = vadd.f32 %v191_v7, %v138_v8 }
 0x10d   :  { %v150_v11 = vadd.f32 %v236_v9, %v191_v7  ;;  %v141_v12 = vpop.f32.mrb[3].mxu0 }
 0x10e   :  { %v142_v14 = vadd.f32 %v191_v7, %v141_v12 }
 0x10f   :  { %v216_v15 = vpack.c.bf16 %v150_v11, %v147_v10 }
 0x110   :  { %v211_v16 = vpack.c.bf16 %v142_v14, %v139_v13 }
 0x111   :  { %218 = vst [vmem:[#allocation7 + $0x8] sm:$0xff] %v216_v15  }
 0x112   :  { %212 = vst [vmem:[#allocation7] sm:$0xff] %v211_v16  }
 0x113   :  { %303 = shalt.err (!%p300_p6)
}
 0x114   :  { %s304_s15 = scalar_lea.hbm %s396_s3, 256 }
 0x115   :  { %p305_p7 = scmp.ne.s32.totalorder %s396_s3, %s304_s15  ;;  %p308_p8 = scmp.lt.u32.totalorder %s304_s15, %s396_s3 }
 0x117   :  { %p310_p9 = pnand %p308_p8, %p305_p7 }
 0x119   :  { %313 = shalt.err (!%p310_p9)
}
 0x11a   :  { %184 = dma.vmem_to_hbm [thread:$0]  %s179_s12, 256, %s396_s3, [#allocation4], %s321_s22, %s321_s22, %s322_s23  }
 0x11b   :  { %318 = dma.done.wait [#allocation4], 256  }
 0x11c   :  { %319 = vsyncadd [#allocation4], 4294967040 }
 0x11d   :  { %188 = vsyncpa [#allocation3], 1 }
 0x11e   :  { %189 = vsyncpa [#allocation6], 1 }
 0x11f   :  { %190 = vsyncpa [#allocation4], 1 }

</bundles_post_ra>
